<compile_context>
chip_gen: v6e
topology: v6e:2x2x1
jax: 0.10.0
libtpu: 0.0.40
codegen_flags: <defaults>
</compile_context>

<pallas_src>
import functools

import jax
import jax.numpy as jnp
from jax.experimental import pallas as pl
from jax.experimental.pallas import tpu as pltpu


# ---------------------------------------------------------------------------
# kernel
# ---------------------------------------------------------------------------

def _linear(x, w_ref, b_ref, matmul_dtype):
    """y = x @ W + b.  W is already stored in matmul_dtype (pre-cast in the
    wrapper); only the activation is cast. Accumulation / bias add stay f32."""
    acc = jnp.dot(
        x.astype(matmul_dtype),
        w_ref[...],
        preferred_element_type=jnp.float32,
    )
    return acc + b_ref[...]


def _sigmoid(x):
    # Exact logistic: exp goes to the EUP; the divide is cheap and keeps
    # numerical parity with torch.sigmoid (approx reciprocal was the main
    # correctness concern since its error feeds encoder2).
    return 1.0 / (1.0 + jnp.exp(-x))


def vae_kernel(
    # activations / noise (batch-tiled)
    x_ref, eps1_ref, eps2_ref,
    # encoder1 (fc_mu|fc_logvar fused)
    e1_fc1_w, e1_fc1_b, e1_mulv_w, e1_mulv_b,
    # decoder1
    d1_fc1_w, d1_fc1_b, d1_fc2_w, d1_fc2_b,
    # encoder2 (fused)
    e2_fc1_w, e2_fc1_b, e2_mulv_w, e2_mulv_b,
    # decoder2
    d2_fc1_w, d2_fc1_b, d2_fc2_w, d2_fc2_b,
    # single lane-dense output slab: [xhat2 | mu1 | logvar1 | mu2 | logvar2 | 0-pad]
    out_ref,
    *, latent_dim, matmul_dtype, lane_pad,
):
    L = latent_dim
    x = x_ref[...]

    # ---- encoder 1 (mu & logvar in one matmul) ----
    h1 = jnp.maximum(_linear(x, e1_fc1_w, e1_fc1_b, matmul_dtype), 0.0)
    mulv1 = _linear(h1, e1_mulv_w, e1_mulv_b, matmul_dtype)
    mu1, logvar1 = mulv1[:, :L], mulv1[:, L:]

    # ---- reparameterize 1 ----
    z1 = mu1 + eps1_ref[...] * jnp.exp(0.5 * logvar1)

    # ---- decoder 1 ----
    hd1 = jnp.maximum(_linear(z1, d1_fc1_w, d1_fc1_b, matmul_dtype), 0.0)
    xhat1 = _sigmoid(_linear(hd1, d1_fc2_w, d1_fc2_b, matmul_dtype))

    # ---- encoder 2 ----
    h2 = jnp.maximum(_linear(xhat1, e2_fc1_w, e2_fc1_b, matmul_dtype), 0.0)
    mulv2 = _linear(h2, e2_mulv_w, e2_mulv_b, matmul_dtype)
    mu2, logvar2 = mulv2[:, :L], mulv2[:, L:]

    # ---- reparameterize 2 ----
    z2 = mu2 + eps2_ref[...] * jnp.exp(0.5 * logvar2)

    # ---- decoder 2 ----
    hd2 = jnp.maximum(_linear(z2, d2_fc1_w, d2_fc1_b, matmul_dtype), 0.0)
    xhat2 = _sigmoid(_linear(hd2, d2_fc2_w, d2_fc2_b, matmul_dtype))

    # One concatenated, lane-dense store built directly from the fused
    # projections (mu/logvar are already lane-adjacent inside mulv1/mulv2),
    # zero-padded to a multiple of 128 lanes.
    parts = [xhat2, mulv1, mulv2]
    if lane_pad > 0:
        parts.append(jnp.zeros((xhat2.shape[0], lane_pad), jnp.float32))
    out_ref[...] = jnp.concatenate(parts, axis=-1)


# ---------------------------------------------------------------------------
# parameter handling
# ---------------------------------------------------------------------------

def init_vae_params(key, input_dim, hidden_dim, latent_dim):
    """PyTorch-style params (unfused), torch.nn.Linear default init."""
    def lin(k, fan_in, fan_out):
        kw, kb = jax.random.split(k)
        bound = 1.0 / jnp.sqrt(jnp.float32(fan_in))
        w = jax.random.uniform(kw, (fan_in, fan_out), jnp.float32, -bound, bound)
        b = jax.random.uniform(kb, (1, fan_out), jnp.float32, -bound, bound)
        return w, b

    keys = jax.random.split(key, 10)
    params = []
    params += list(lin(keys[0], input_dim, hidden_dim))    # enc1.fc1
    params += list(lin(keys[1], hidden_dim, latent_dim))   # enc1.fc_mu
    params += list(lin(keys[2], hidden_dim, latent_dim))   # enc1.fc_logvar
    params += list(lin(keys[3], latent_dim, hidden_dim))   # dec1.fc1
    params += list(lin(keys[4], hidden_dim, input_dim))    # dec1.fc2
    params += list(lin(keys[5], input_dim, hidden_dim))    # enc2.fc1
    params += list(lin(keys[6], hidden_dim, latent_dim))   # enc2.fc_mu
    params += list(lin(keys[7], hidden_dim, latent_dim))   # enc2.fc_logvar
    params += list(lin(keys[8], latent_dim, hidden_dim))   # dec2.fc1
    params += list(lin(keys[9], hidden_dim, input_dim))    # dec2.fc2
    return params


def fuse_params(params):
    """Concatenate each encoder's fc_mu / fc_logvar into one projection.
    Returns flat list [w, b, w, b, ...] (8 layers -> 16 arrays)."""
    (e1w1, e1b1, e1wm, e1bm, e1wl, e1bl,
     d1w1, d1b1, d1w2, d1b2,
     e2w1, e2b1, e2wm, e2bm, e2wl, e2bl,
     d2w1, d2b1, d2w2, d2b2) = params
    return [
        e1w1, e1b1,
        jnp.concatenate([e1wm, e1wl], axis=1),
        jnp.concatenate([e1bm, e1bl], axis=1),
        d1w1, d1b1, d1w2, d1b2,
        e2w1, e2b1,
        jnp.concatenate([e2wm, e2wl], axis=1),
        jnp.concatenate([e2bm, e2bl], axis=1),
        d2w1, d2b1, d2w2, d2b2,
    ]


# ---------------------------------------------------------------------------
# wrapper
# ---------------------------------------------------------------------------

def _round_up(x, m):
    return ((x + m - 1) // m) * m


def _pick_tile_b(B, input_dim, hidden_dim, latent_dim, out_width_padded,
                 *, max_tile=8192, budget_bytes=24 << 20):
    """VMEM-budgeted batch tile.

    budget_bytes (~24 MiB) is conservative even for v7x (64 MiB physical,
    32 MiB default scoped) once the streamed activation blocks are
    double-buffered; v5e/v6e (128 MiB) comfortably take the same tile.
    Guarantees >=2 grid steps for large B so v7x's two TensorCores both get
    work under dimension_semantics=("parallel",).
    """
    # streamed f32 blocks (x, eps1, eps2, out), double-buffered by the pipeline
    stream_bytes = 4 * (input_dim + 2 * latent_dim + out_width_padded) * 2
    # rough per-row activation / spill slack inside the kernel body
    act_bytes = 4 * (2 * hidden_dim + 4 * latent_dim + 2 * input_dim)
    per_row = stream_bytes + act_bytes

    tile = min(max_tile, max(8, budget_bytes // per_row))
    tile = max(8, (tile // 8) * 8)
    tile = min(tile, _round_up(B, 8))          # never bigger than (padded) B
    if B >= 1024:                               # keep both v7x TCs busy
        tile = min(tile, _round_up(pl.cdiv(B, 2), 8))
    return tile


@functools.partial(
    jax.jit,
    static_argnames=("input_dim", "hidden_dim", "latent_dim", "matmul_dtype"),
)
def vae_forward(x, eps1, eps2, fused_params, *, input_dim, hidden_dim,
                latent_dim, matmul_dtype=jnp.bfloat16):
    B = x.shape[0]
    L = latent_dim
    out_width = input_dim + 4 * L
    out_width_padded = _round_up(out_width, 128)   # always-unmasked lane-dense store
    lane_pad = out_width_padded - out_width

    tile_b = _pick_tile_b(B, input_dim, hidden_dim, latent_dim, out_width_padded)
    grid_b = pl.cdiv(B, tile_b)
    B_pad = grid_b * tile_b

    # Pad batch to a multiple of the tile (robust for any B, incl. primes).
    if B_pad != B:
        pad = B_pad - B
        x = jnp.pad(x, ((0, pad), (0, 0)))
        eps1 = jnp.pad(eps1, ((0, pad), (0, 0)))
        eps2 = jnp.pad(eps2, ((0, pad), (0, 0)))

    # Pre-cast loop-invariant weights ONCE (biases stay f32 for the f32 add).
    params = []
    for idx, p in enumerate(fused_params):
        is_weight = (idx % 2 == 0)
        params.append(p.astype(matmul_dtype) if is_weight else p.astype(jnp.float32))

    def act_spec(feat):
        return pl.BlockSpec((tile_b, feat), lambda i: (i, 0))

    def const_spec(arr):
        # whole-array block, constant index map -> stays VMEM-resident,
        # never re-DMA'd across batch tiles.
        return pl.BlockSpec(arr.shape, lambda i: (0, 0))

    in_specs = ([act_spec(input_dim), act_spec(L), act_spec(L)]
                + [const_spec(p) for p in params])

    kernel = functools.partial(
        vae_kernel, latent_dim=latent_dim, matmul_dtype=matmul_dtype,
        lane_pad=lane_pad)

    # flops: 8 matmuls (2 per enc/dec pair fused), 2 flops/MAC.
    flops_per_row = 2 * 2 * (input_dim * hidden_dim + hidden_dim * 2 * L
                             + L * hidden_dim + hidden_dim * input_dim)
    transc_per_row = 2 * (L + input_dim)           # reparam exps + sigmoid exps
    param_bytes = sum(int(p.size) * p.dtype.itemsize for p in params)
    bytes_accessed = (B_pad * 4 * (input_dim + 2 * L + out_width_padded)
                      + param_bytes)

    out = pl.pallas_call(
        kernel,
        out_shape=jax.ShapeDtypeStruct((B_pad, out_width_padded), jnp.float32),
        grid=(grid_b,),
        in_specs=in_specs,
        out_specs=pl.BlockSpec((tile_b, out_width_padded), lambda i: (i, 0)),
        compiler_params=pltpu.CompilerParams(
            dimension_semantics=("parallel",),      # megacore sharding on v7x
            vmem_limit_bytes=48 * 1024 * 1024,      # < v7x 64 MiB physical
        ),
        cost_estimate=pl.CostEstimate(
            flops=B_pad * flops_per_row,
            transcendentals=B_pad * transc_per_row,
            bytes_accessed=bytes_accessed,
        ),
    )(x, eps1, eps2, *params)

    # slice the lane-dense slab back into the 5 PyTorch-style outputs
    out = out[:B]
    xhat2 = out[:, :input_dim]
    mu1 = out[:, input_dim:input_dim + L]
    logvar1 = out[:, input_dim + L:input_dim + 2 * L]
    mu2 = out[:, input_dim + 2 * L:input_dim + 3 * L]
    logvar2 = out[:, input_dim + 3 * L:input_dim + 4 * L]
    return xhat2, mu1, logvar1, mu2, logvar2


# ---------------------------------------------------------------------------
# pure-JAX reference (unfused params, exact sigmoid)
# ---------------------------------------------------------------------------

def vae_reference(x, eps1, eps2, params):
    (e1w1, e1b1, e1wm, e1bm, e1wl, e1bl,
     d1w1, d1b1, d1w2, d1b2,
     e2w1, e2b1, e2wm, e2bm, e2wl, e2bl,
     d2w1, d2b1, d2w2, d2b2) = params

    h1 = jax.nn.relu(x @ e1w1 + e1b1)
    mu1 = h1 @ e1wm + e1bm
    lv1 = h1 @ e1wl + e1bl
    z1 = mu1 + eps1 * jnp.exp(0.5 * lv1)
    hd1 = jax.nn.relu(z1 @ d1w1 + d1b1)
    xh1 = jax.nn.sigmoid(hd1 @ d1w2 + d1b2)
    h2 = jax.nn.relu(xh1 @ e2w1 + e2b1)
    mu2 = h2 @ e2wm + e2bm
    lv2 = h2 @ e2wl + e2bl
    z2 = mu2 + eps2 * jnp.exp(0.5 * lv2)
    hd2 = jax.nn.relu(z2 @ d2w1 + d2b1)
    xh2 = jax.nn.sigmoid(hd2 @ d2w2 + d2b2)
    return xh2, mu1, lv1, mu2, lv2


if __name__ == "__main__":
    B, INPUT_DIM, HIDDEN_DIM, LATENT_DIM = 8, 64, 32, 16

    key = jax.random.PRNGKey(0)
    kx, keps1, keps2, kparams = jax.random.split(key, 4)

    x = jax.random.normal(kx, (B, INPUT_DIM), jnp.float32)
    eps1 = jax.random.normal(keps1, (B, LATENT_DIM), jnp.float32)
    eps2 = jax.random.normal(keps2, (B, LATENT_DIM), jnp.float32)

    params = init_vae_params(kparams, INPUT_DIM, HIDDEN_DIM, LATENT_DIM)
    fparams = fuse_params(params)

    refs = vae_reference(x, eps1, eps2, params)
    names = ("xhat2", "mu1", "logvar1", "mu2", "logvar2")

    # ---- f32-operand path: exact sigmoid -> tight tolerance on everything ----
    outs_f32 = vae_forward(
        x, eps1, eps2, fparams,
        input_dim=INPUT_DIM, hidden_dim=HIDDEN_DIM, latent_dim=LATENT_DIM,
        matmul_dtype=jnp.float32,
    )
    outs_f32 = jax.block_until_ready(outs_f32)
    for o, r, name in zip(outs_f32, refs, names):
        assert o.shape == r.shape and o.dtype == r.dtype, f"{name} shape/dtype"
        assert jnp.allclose(o, r, atol=1e-4, rtol=1e-4), f"{name} mismatch (f32)"

    # ---- default bf16-operand path (f32 accumulation) -> looser tolerance ----
    outs_bf16 = vae_forward(
        x, eps1, eps2, fparams,
        input_dim=INPUT_DIM, hidden_dim=HIDDEN_DIM, latent_dim=LATENT_DIM,
    )
    outs_bf16 = jax.block_until_ready(outs_bf16)
    for o, r, name in zip(outs_bf16, refs, names):
        assert o.shape == r.shape, f"{name} shape"
        assert jnp.allclose(o, r, atol=1e-1, rtol=1e-1), f"{name} mismatch (bf16)"

    print("KERNEL_OK")
</pallas_src>

<mosaic_0001>
module attributes {stable_mosaic.version = 11 : i64} {
  func.func @vae_kernel(%arg0: i32, %arg1: memref<8x64xf32, #tpu.memory_space<vmem>>, %arg2: memref<8x16xf32, #tpu.memory_space<vmem>>, %arg3: memref<8x16xf32, #tpu.memory_space<vmem>>, %arg4: memref<64x32xf32, #tpu.memory_space<vmem>>, %arg5: memref<1x32xf32, #tpu.memory_space<vmem>>, %arg6: memref<32x32xf32, #tpu.memory_space<vmem>>, %arg7: memref<1x32xf32, #tpu.memory_space<vmem>>, %arg8: memref<16x32xf32, #tpu.memory_space<vmem>>, %arg9: memref<1x32xf32, #tpu.memory_space<vmem>>, %arg10: memref<32x64xf32, #tpu.memory_space<vmem>>, %arg11: memref<1x64xf32, #tpu.memory_space<vmem>>, %arg12: memref<64x32xf32, #tpu.memory_space<vmem>>, %arg13: memref<1x32xf32, #tpu.memory_space<vmem>>, %arg14: memref<32x32xf32, #tpu.memory_space<vmem>>, %arg15: memref<1x32xf32, #tpu.memory_space<vmem>>, %arg16: memref<16x32xf32, #tpu.memory_space<vmem>>, %arg17: memref<1x32xf32, #tpu.memory_space<vmem>>, %arg18: memref<32x64xf32, #tpu.memory_space<vmem>>, %arg19: memref<1x64xf32, #tpu.memory_space<vmem>>, %arg20: memref<8x128xf32, #tpu.memory_space<vmem>>) attributes {dimension_semantics = [#tpu.dimension_semantics<parallel>], iteration_bounds = array<i64: 1>, scalar_prefetch = 0 : i64, scratch_operands = 0 : i64, tpu.core_type = #tpu.core_type<tc>, window_params = [{transform_indices = @transform_0, window_bounds = array<i64: 8, 64>}, {transform_indices = @transform_1, window_bounds = array<i64: 8, 16>}, {transform_indices = @transform_2, window_bounds = array<i64: 8, 16>}, {pipeline_mode = #tpu.pipeline_mode<synchronous>, transform_indices = @transform_3, window_bounds = array<i64: 64, 32>}, {pipeline_mode = #tpu.pipeline_mode<synchronous>, transform_indices = @transform_4, window_bounds = array<i64: 1, 32>}, {pipeline_mode = #tpu.pipeline_mode<synchronous>, transform_indices = @transform_5, window_bounds = array<i64: 32, 32>}, {pipeline_mode = #tpu.pipeline_mode<synchronous>, transform_indices = @transform_6, window_bounds = array<i64: 1, 32>}, {pipeline_mode = #tpu.pipeline_mode<synchronous>, transform_indices = @transform_7, window_bounds = array<i64: 16, 32>}, {pipeline_mode = #tpu.pipeline_mode<synchronous>, transform_indices = @transform_8, window_bounds = array<i64: 1, 32>}, {pipeline_mode = #tpu.pipeline_mode<synchronous>, transform_indices = @transform_9, window_bounds = array<i64: 32, 64>}, {pipeline_mode = #tpu.pipeline_mode<synchronous>, transform_indices = @transform_10, window_bounds = array<i64: 1, 64>}, {pipeline_mode = #tpu.pipeline_mode<synchronous>, transform_indices = @transform_11, window_bounds = array<i64: 64, 32>}, {pipeline_mode = #tpu.pipeline_mode<synchronous>, transform_indices = @transform_12, window_bounds = array<i64: 1, 32>}, {pipeline_mode = #tpu.pipeline_mode<synchronous>, transform_indices = @transform_13, window_bounds = array<i64: 32, 32>}, {pipeline_mode = #tpu.pipeline_mode<synchronous>, transform_indices = @transform_14, window_bounds = array<i64: 1, 32>}, {pipeline_mode = #tpu.pipeline_mode<synchronous>, transform_indices = @transform_15, window_bounds = array<i64: 16, 32>}, {pipeline_mode = #tpu.pipeline_mode<synchronous>, transform_indices = @transform_16, window_bounds = array<i64: 1, 32>}, {pipeline_mode = #tpu.pipeline_mode<synchronous>, transform_indices = @transform_17, window_bounds = array<i64: 32, 64>}, {pipeline_mode = #tpu.pipeline_mode<synchronous>, transform_indices = @transform_18, window_bounds = array<i64: 1, 64>}, {transform_indices = @transform_19, window_bounds = array<i64: 8, 128>}]} {
    %c0 = arith.constant 0 : index
    %c0_0 = arith.constant 0 : index
    %0 = vector.load %arg1[%c0, %c0_0] : memref<8x64xf32, #tpu.memory_space<vmem>>, vector<8x64xf32>
    %c0_1 = arith.constant 0 : index
    %c0_2 = arith.constant 0 : index
    %1 = vector.load %arg4[%c0_1, %c0_2] : memref<64x32xf32, #tpu.memory_space<vmem>>, vector<64x32xf32>
    %cst = arith.constant dense<0.000000e+00> : vector<8x32xf32>
    %2 = tpu.matmul %0, %1, %cst {dimension_numbers = #tpu.dot_dimension_numbers<[1], [0], [0], [1], [0, 0, 1, 1], [], []>} : vector<8x64xf32>, vector<64x32xf32>, vector<8x32xf32> -> vector<8x32xf32>
    %c0_3 = arith.constant 0 : index
    %c0_4 = arith.constant 0 : index
    %3 = vector.load %arg5[%c0_3, %c0_4] : memref<1x32xf32, #tpu.memory_space<vmem>>, vector<1x32xf32>
    %4 = vector.broadcast %3 : vector<1x32xf32> to vector<8x32xf32>
    %5 = arith.addf %2, %4 : vector<8x32xf32>
    %cst_5 = arith.constant 0.000000e+00 : f32
    %6 = vector.broadcast %cst_5 : f32 to vector<8x32xf32>
    %7 = arith.maximumf %5, %6 : vector<8x32xf32>
    %c0_6 = arith.constant 0 : index
    %c0_7 = arith.constant 0 : index
    %8 = vector.load %arg6[%c0_6, %c0_7] : memref<32x32xf32, #tpu.memory_space<vmem>>, vector<32x32xf32>
    %cst_8 = arith.constant dense<0.000000e+00> : vector<8x32xf32>
    %9 = tpu.matmul %7, %8, %cst_8 {dimension_numbers = #tpu.dot_dimension_numbers<[1], [0], [0], [1], [0, 0, 1, 1], [], []>} : vector<8x32xf32>, vector<32x32xf32>, vector<8x32xf32> -> vector<8x32xf32>
    %c0_9 = arith.constant 0 : index
    %c0_10 = arith.constant 0 : index
    %10 = vector.load %arg7[%c0_9, %c0_10] : memref<1x32xf32, #tpu.memory_space<vmem>>, vector<1x32xf32>
    %11 = vector.broadcast %10 : vector<1x32xf32> to vector<8x32xf32>
    %12 = arith.addf %9, %11 : vector<8x32xf32>
    %13 = vector.extract_strided_slice %12 {offsets = [0, 0], sizes = [8, 16], strides = [1, 1]} : vector<8x32xf32> to vector<8x16xf32>
    %14 = vector.extract_strided_slice %12 {offsets = [0, 16], sizes = [8, 16], strides = [1, 1]} : vector<8x32xf32> to vector<8x16xf32>
    %c0_11 = arith.constant 0 : index
    %c0_12 = arith.constant 0 : index
    %15 = vector.load %arg2[%c0_11, %c0_12] : memref<8x16xf32, #tpu.memory_space<vmem>>, vector<8x16xf32>
    %cst_13 = arith.constant 5.000000e-01 : f32
    %16 = vector.broadcast %cst_13 : f32 to vector<8x16xf32>
    %17 = arith.mulf %16, %14 : vector<8x16xf32>
    %18 = math.exp %17 : vector<8x16xf32>
    %19 = arith.mulf %15, %18 : vector<8x16xf32>
    %20 = arith.addf %13, %19 : vector<8x16xf32>
    %c0_14 = arith.constant 0 : index
    %c0_15 = arith.constant 0 : index
    %21 = vector.load %arg8[%c0_14, %c0_15] : memref<16x32xf32, #tpu.memory_space<vmem>>, vector<16x32xf32>
    %cst_16 = arith.constant dense<0.000000e+00> : vector<8x32xf32>
    %22 = tpu.matmul %20, %21, %cst_16 {dimension_numbers = #tpu.dot_dimension_numbers<[1], [0], [0], [1], [0, 0, 1, 1], [], []>} : vector<8x16xf32>, vector<16x32xf32>, vector<8x32xf32> -> vector<8x32xf32>
    %c0_17 = arith.constant 0 : index
    %c0_18 = arith.constant 0 : index
    %23 = vector.load %arg9[%c0_17, %c0_18] : memref<1x32xf32, #tpu.memory_space<vmem>>, vector<1x32xf32>
    %24 = vector.broadcast %23 : vector<1x32xf32> to vector<8x32xf32>
    %25 = arith.addf %22, %24 : vector<8x32xf32>
    %cst_19 = arith.constant 0.000000e+00 : f32
    %26 = vector.broadcast %cst_19 : f32 to vector<8x32xf32>
    %27 = arith.maximumf %25, %26 : vector<8x32xf32>
    %c0_20 = arith.constant 0 : index
    %c0_21 = arith.constant 0 : index
    %28 = vector.load %arg10[%c0_20, %c0_21] : memref<32x64xf32, #tpu.memory_space<vmem>>, vector<32x64xf32>
    %cst_22 = arith.constant dense<0.000000e+00> : vector<8x64xf32>
    %29 = tpu.matmul %27, %28, %cst_22 {dimension_numbers = #tpu.dot_dimension_numbers<[1], [0], [0], [1], [0, 0, 1, 1], [], []>} : vector<8x32xf32>, vector<32x64xf32>, vector<8x64xf32> -> vector<8x64xf32>
    %c0_23 = arith.constant 0 : index
    %c0_24 = arith.constant 0 : index
    %30 = vector.load %arg11[%c0_23, %c0_24] : memref<1x64xf32, #tpu.memory_space<vmem>>, vector<1x64xf32>
    %31 = vector.broadcast %30 : vector<1x64xf32> to vector<8x64xf32>
    %32 = arith.addf %29, %31 : vector<8x64xf32>
    %cst_25 = arith.constant 0.000000e+00 : f32
    %33 = vector.broadcast %cst_25 : f32 to vector<8x64xf32>
    %34 = arith.subf %33, %32 : vector<8x64xf32>
    %35 = math.exp %34 : vector<8x64xf32>
    %cst_26 = arith.constant 1.000000e+00 : f32
    %36 = vector.broadcast %cst_26 : f32 to vector<8x64xf32>
    %37 = arith.addf %36, %35 : vector<8x64xf32>
    %cst_27 = arith.constant 1.000000e+00 : f32
    %38 = vector.broadcast %cst_27 : f32 to vector<8x64xf32>
    %39 = arith.divf %38, %37 : vector<8x64xf32>
    %c0_28 = arith.constant 0 : index
    %c0_29 = arith.constant 0 : index
    %40 = vector.load %arg12[%c0_28, %c0_29] : memref<64x32xf32, #tpu.memory_space<vmem>>, vector<64x32xf32>
    %cst_30 = arith.constant dense<0.000000e+00> : vector<8x32xf32>
    %41 = tpu.matmul %39, %40, %cst_30 {dimension_numbers = #tpu.dot_dimension_numbers<[1], [0], [0], [1], [0, 0, 1, 1], [], []>} : vector<8x64xf32>, vector<64x32xf32>, vector<8x32xf32> -> vector<8x32xf32>
    %c0_31 = arith.constant 0 : index
    %c0_32 = arith.constant 0 : index
    %42 = vector.load %arg13[%c0_31, %c0_32] : memref<1x32xf32, #tpu.memory_space<vmem>>, vector<1x32xf32>
    %43 = vector.broadcast %42 : vector<1x32xf32> to vector<8x32xf32>
    %44 = arith.addf %41, %43 : vector<8x32xf32>
    %cst_33 = arith.constant 0.000000e+00 : f32
    %45 = vector.broadcast %cst_33 : f32 to vector<8x32xf32>
    %46 = arith.maximumf %44, %45 : vector<8x32xf32>
    %c0_34 = arith.constant 0 : index
    %c0_35 = arith.constant 0 : index
    %47 = vector.load %arg14[%c0_34, %c0_35] : memref<32x32xf32, #tpu.memory_space<vmem>>, vector<32x32xf32>
    %cst_36 = arith.constant dense<0.000000e+00> : vector<8x32xf32>
    %48 = tpu.matmul %46, %47, %cst_36 {dimension_numbers = #tpu.dot_dimension_numbers<[1], [0], [0], [1], [0, 0, 1, 1], [], []>} : vector<8x32xf32>, vector<32x32xf32>, vector<8x32xf32> -> vector<8x32xf32>
    %c0_37 = arith.constant 0 : index
    %c0_38 = arith.constant 0 : index
    %49 = vector.load %arg15[%c0_37, %c0_38] : memref<1x32xf32, #tpu.memory_space<vmem>>, vector<1x32xf32>
    %50 = vector.broadcast %49 : vector<1x32xf32> to vector<8x32xf32>
    %51 = arith.addf %48, %50 : vector<8x32xf32>
    %52 = vector.extract_strided_slice %51 {offsets = [0, 0], sizes = [8, 16], strides = [1, 1]} : vector<8x32xf32> to vector<8x16xf32>
    %53 = vector.extract_strided_slice %51 {offsets = [0, 16], sizes = [8, 16], strides = [1, 1]} : vector<8x32xf32> to vector<8x16xf32>
    %c0_39 = arith.constant 0 : index
    %c0_40 = arith.constant 0 : index
    %54 = vector.load %arg3[%c0_39, %c0_40] : memref<8x16xf32, #tpu.memory_space<vmem>>, vector<8x16xf32>
    %cst_41 = arith.constant 5.000000e-01 : f32
    %55 = vector.broadcast %cst_41 : f32 to vector<8x16xf32>
    %56 = arith.mulf %55, %53 : vector<8x16xf32>
    %57 = math.exp %56 : vector<8x16xf32>
    %58 = arith.mulf %54, %57 : vector<8x16xf32>
    %59 = arith.addf %52, %58 : vector<8x16xf32>
    %c0_42 = arith.constant 0 : index
    %c0_43 = arith.constant 0 : index
    %60 = vector.load %arg16[%c0_42, %c0_43] : memref<16x32xf32, #tpu.memory_space<vmem>>, vector<16x32xf32>
    %cst_44 = arith.constant dense<0.000000e+00> : vector<8x32xf32>
    %61 = tpu.matmul %59, %60, %cst_44 {dimension_numbers = #tpu.dot_dimension_numbers<[1], [0], [0], [1], [0, 0, 1, 1], [], []>} : vector<8x16xf32>, vector<16x32xf32>, vector<8x32xf32> -> vector<8x32xf32>
    %c0_45 = arith.constant 0 : index
    %c0_46 = arith.constant 0 : index
    %62 = vector.load %arg17[%c0_45, %c0_46] : memref<1x32xf32, #tpu.memory_space<vmem>>, vector<1x32xf32>
    %63 = vector.broadcast %62 : vector<1x32xf32> to vector<8x32xf32>
    %64 = arith.addf %61, %63 : vector<8x32xf32>
    %cst_47 = arith.constant 0.000000e+00 : f32
    %65 = vector.broadcast %cst_47 : f32 to vector<8x32xf32>
    %66 = arith.maximumf %64, %65 : vector<8x32xf32>
    %c0_48 = arith.constant 0 : index
    %c0_49 = arith.constant 0 : index
    %67 = vector.load %arg18[%c0_48, %c0_49] : memref<32x64xf32, #tpu.memory_space<vmem>>, vector<32x64xf32>
    %cst_50 = arith.constant dense<0.000000e+00> : vector<8x64xf32>
    %68 = tpu.matmul %66, %67, %cst_50 {dimension_numbers = #tpu.dot_dimension_numbers<[1], [0], [0], [1], [0, 0, 1, 1], [], []>} : vector<8x32xf32>, vector<32x64xf32>, vector<8x64xf32> -> vector<8x64xf32>
    %c0_51 = arith.constant 0 : index
    %c0_52 = arith.constant 0 : index
    %69 = vector.load %arg19[%c0_51, %c0_52] : memref<1x64xf32, #tpu.memory_space<vmem>>, vector<1x64xf32>
    %70 = vector.broadcast %69 : vector<1x64xf32> to vector<8x64xf32>
    %71 = arith.addf %68, %70 : vector<8x64xf32>
    %cst_53 = arith.constant 0.000000e+00 : f32
    %72 = vector.broadcast %cst_53 : f32 to vector<8x64xf32>
    %73 = arith.subf %72, %71 : vector<8x64xf32>
    %74 = math.exp %73 : vector<8x64xf32>
    %cst_54 = arith.constant 1.000000e+00 : f32
    %75 = vector.broadcast %cst_54 : f32 to vector<8x64xf32>
    %76 = arith.addf %75, %74 : vector<8x64xf32>
    %cst_55 = arith.constant 1.000000e+00 : f32
    %77 = vector.broadcast %cst_55 : f32 to vector<8x64xf32>
    %78 = arith.divf %77, %76 : vector<8x64xf32>
    %79 = tpu.concatenate %78, %12, %51 in 1 : vector<8x64xf32>, vector<8x32xf32>, vector<8x32xf32> -> vector<8x128xf32>
    %c0_56 = arith.constant 0 : index
    %c0_57 = arith.constant 0 : index
    %80 = vector.load %arg20[%c0_56, %c0_57] : memref<8x128xf32, #tpu.memory_space<vmem>>, vector<8x128xf32>
    tpu.vector_store %arg20[%c0_56, %c0_57], %79 {strides = array<i32>} : memref<8x128xf32, #tpu.memory_space<vmem>>, vector<8x128xf32>,
    return
  }
  func.func @transform_0(%arg0: i32) -> (i32, i32) {
    %c0_i32 = arith.constant 0 : i32
    %c0_i32_0 = arith.constant 0 : i32
    return %arg0, %c0_i32 : i32, i32
  }
  func.func @transform_1(%arg0: i32) -> (i32, i32) {
    %c0_i32 = arith.constant 0 : i32
    %c0_i32_0 = arith.constant 0 : i32
    return %arg0, %c0_i32 : i32, i32
  }
  func.func @transform_2(%arg0: i32) -> (i32, i32) {
    %c0_i32 = arith.constant 0 : i32
    %c0_i32_0 = arith.constant 0 : i32
    return %arg0, %c0_i32 : i32, i32
  }
  func.func @transform_3(%arg0: i32) -> (i32, i32) {
    %c0_i32 = arith.constant 0 : i32
    %c0_i32_0 = arith.constant 0 : i32
    %c0_i32_1 = arith.constant 0 : i32
    return %c0_i32, %c0_i32_0 : i32, i32
  }
  func.func @transform_4(%arg0: i32) -> (i32, i32) {
    %c0_i32 = arith.constant 0 : i32
    %c0_i32_0 = arith.constant 0 : i32
    %c0_i32_1 = arith.constant 0 : i32
    return %c0_i32, %c0_i32_0 : i32, i32
  }
  func.func @transform_5(%arg0: i32) -> (i32, i32) {
    %c0_i32 = arith.constant 0 : i32
    %c0_i32_0 = arith.constant 0 : i32
    %c0_i32_1 = arith.constant 0 : i32
    return %c0_i32, %c0_i32_0 : i32, i32
  }
  func.func @transform_6(%arg0: i32) -> (i32, i32) {
    %c0_i32 = arith.constant 0 : i32
    %c0_i32_0 = arith.constant 0 : i32
    %c0_i32_1 = arith.constant 0 : i32
    return %c0_i32, %c0_i32_0 : i32, i32
  }
  func.func @transform_7(%arg0: i32) -> (i32, i32) {
    %c0_i32 = arith.constant 0 : i32
    %c0_i32_0 = arith.constant 0 : i32
    %c0_i32_1 = arith.constant 0 : i32
    return %c0_i32, %c0_i32_0 : i32, i32
  }
  func.func @transform_8(%arg0: i32) -> (i32, i32) {
    %c0_i32 = arith.constant 0 : i32
    %c0_i32_0 = arith.constant 0 : i32
    %c0_i32_1 = arith.constant 0 : i32
    return %c0_i32, %c0_i32_0 : i32, i32
  }
  func.func @transform_9(%arg0: i32) -> (i32, i32) {
    %c0_i32 = arith.constant 0 : i32
    %c0_i32_0 = arith.constant 0 : i32
    %c0_i32_1 = arith.constant 0 : i32
    return %c0_i32, %c0_i32_0 : i32, i32
  }
  func.func @transform_10(%arg0: i32) -> (i32, i32) {
    %c0_i32 = arith.constant 0 : i32
    %c0_i32_0 = arith.constant 0 : i32
    %c0_i32_1 = arith.constant 0 : i32
    return %c0_i32, %c0_i32_0 : i32, i32
  }
  func.func @transform_11(%arg0: i32) -> (i32, i32) {
    %c0_i32 = arith.constant 0 : i32
    %c0_i32_0 = arith.constant 0 : i32
    %c0_i32_1 = arith.constant 0 : i32
    return %c0_i32, %c0_i32_0 : i32, i32
  }
  func.func @transform_12(%arg0: i32) -> (i32, i32) {
    %c0_i32 = arith.constant 0 : i32
    %c0_i32_0 = arith.constant 0 : i32
    %c0_i32_1 = arith.constant 0 : i32
    return %c0_i32, %c0_i32_0 : i32, i32
  }
  func.func @transform_13(%arg0: i32) -> (i32, i32) {
    %c0_i32 = arith.constant 0 : i32
    %c0_i32_0 = arith.constant 0 : i32
    %c0_i32_1 = arith.constant 0 : i32
    return %c0_i32, %c0_i32_0 : i32, i32
  }
  func.func @transform_14(%arg0: i32) -> (i32, i32) {
    %c0_i32 = arith.constant 0 : i32
    %c0_i32_0 = arith.constant 0 : i32
    %c0_i32_1 = arith.constant 0 : i32
    return %c0_i32, %c0_i32_0 : i32, i32
  }
  func.func @transform_15(%arg0: i32) -> (i32, i32) {
    %c0_i32 = arith.constant 0 : i32
    %c0_i32_0 = arith.constant 0 : i32
    %c0_i32_1 = arith.constant 0 : i32
    return %c0_i32, %c0_i32_0 : i32, i32
  }
  func.func @transform_16(%arg0: i32) -> (i32, i32) {
    %c0_i32 = arith.constant 0 : i32
    %c0_i32_0 = arith.constant 0 : i32
    %c0_i32_1 = arith.constant 0 : i32
    return %c0_i32, %c0_i32_0 : i32, i32
  }
  func.func @transform_17(%arg0: i32) -> (i32, i32) {
    %c0_i32 = arith.constant 0 : i32
    %c0_i32_0 = arith.constant 0 : i32
    %c0_i32_1 = arith.constant 0 : i32
    return %c0_i32, %c0_i32_0 : i32, i32
  }
  func.func @transform_18(%arg0: i32) -> (i32, i32) {
    %c0_i32 = arith.constant 0 : i32
    %c0_i32_0 = arith.constant 0 : i32
    %c0_i32_1 = arith.constant 0 : i32
    return %c0_i32, %c0_i32_0 : i32, i32
  }
  func.func @transform_19(%arg0: i32) -> (i32, i32) {
    %c0_i32 = arith.constant 0 : i32
    %c0_i32_0 = arith.constant 0 : i32
    return %arg0, %c0_i32 : i32, i32
  }
}

</mosaic_0001>

<bundles_post_ra>
// kernel: vae_forward.1
= control target key start
LH: loop header
LB: loop body
LE: loop exit
PB: predicated region body
PF: predicated region fallthrough
CT: control target
= control target key end

     0   :  { %s1386_s0 = inlined_call_operand.hbm [shape: f32[8,64], index: 0, kind: input, shape index: {}]   ;;  %s1387_s1 = inlined_call_operand.hbm [shape: f32[8,16], index: 1, kind: input, shape index: {}]   ;;  %s1388_s2 = inlined_call_operand.hbm [shape: f32[8,16], index: 2, kind: input, shape index: {}]   ;;  %s1389_s3 = inlined_call_operand.vmem [shape: f32[64,32], index: 3, kind: input, shape index: {}]   ;;  %s1390_s4 = inlined_call_operand.vmem [shape: f32[1,32], index: 4, kind: input, shape index: {}]   ;;  %s1391_s5 = inlined_call_operand.vmem [shape: f32[32,32], index: 5, kind: input, shape index: {}]   ;;  %s1392_s6 = inlined_call_operand.vmem [shape: f32[1,32], index: 6, kind: input, shape index: {}]   ;;  %s1393_s7 = inlined_call_operand.vmem [shape: f32[16,32], index: 7, kind: input, shape index: {}]   ;;  %s1394_s8 = inlined_call_operand.vmem [shape: f32[1,32], index: 8, kind: input, shape index: {}]   ;;  %s1395_s9 = inlined_call_operand.vmem [shape: f32[32,64], index: 9, kind: input, shape index: {}]   ;;  %s1396_s10 = inlined_call_operand.vmem [shape: f32[1,64], index: 10, kind: input, shape index: {}]   ;;  %s1397_s11 = inlined_call_operand.vmem [shape: f32[64,32], index: 11, kind: input, shape index: {}]   ;;  %s1398_s12 = inlined_call_operand.vmem [shape: f32[1,32], index: 12, kind: input, shape index: {}]   ;;  %s1399_s13 = inlined_call_operand.vmem [shape: f32[32,32], index: 13, kind: input, shape index: {}]   ;;  %s1400_s14 = inlined_call_operand.vmem [shape: f32[1,32], index: 14, kind: input, shape index: {}]   ;;  %s1401_s15 = inlined_call_operand.vmem [shape: f32[16,32], index: 15, kind: input, shape index: {}]   ;;  %s1402_s16 = inlined_call_operand.vmem [shape: f32[1,32], index: 16, kind: input, shape index: {}]   ;;  %s1403_s17 = inlined_call_operand.vmem [shape: f32[32,64], index: 17, kind: input, shape index: {}]   ;;  %s1404_s18 = inlined_call_operand.vmem [shape: f32[1,64], index: 18, kind: input, shape index: {}]   ;;  %s1405_s19 = inlined_call_operand.vmem [shape: f32[8,128], index: 19, kind: output, shape index: {}]  }
   0x1   :  { %1407 = sst [smem:[#allocation9_spill]] %s1386_s0 }
   0x2   :  { %1408 = sst [smem:[#allocation10_spill]] %s1387_s1 }
   0x3   :  { %1409 = sst [smem:[#allocation11_spill]] %s1388_s2 }
   0x4   :  { %1410 = sst [smem:[#allocation12_spill]] %s1389_s3 }
   0x5   :  { %24 = vsyncpa [#allocation3], 0 }
   0x6   :  { %25 = vsyncpa [#allocation5], 0  ;;  %s1071_s0 = smov [#allocation4]   ;;  %s1072_s20 = smov [#allocation2]  }
   0x7   :  { %s42_s30 = sshll.u32 %s1071_s0, 4  ;;  %s32_s21 = sshll.u32 %s1072_s20, 4  ;;  %s43_s30 = int_to_ptr.vmem [resolvable:$true] %s42_s30  ;;  %s33_s21 = int_to_ptr.vmem [resolvable:$true] %s32_s21 }
   0x8   :  { %s1015_s1 = scalar_lea.vmem %s43_s30, 128  ;;  %p1020_p1 = scmp.lt.s32.totalorder %s43_s30, %s43_s30 }
   0x9   :  { %p1016_p0 = scmp.ne.s32.totalorder %s43_s30, %s1015_s1  ;;  %p1021_p2 = scmp.lt.s32.totalorder %s1015_s1, %s1015_s1 }
   0xb   :  { %p1022_p3 = por %p1021_p2, %p1020_p1 }
   0xd   :  { %p1023_p4 = pnand %p1022_p3, %p1016_p0 }
   0xf   :  { %1026 = shalt.err (!%p1023_p4)
}
  0x10   :  { %s1411_s23 = sld [smem:[#allocation10_spill]]  ;;  %s1035_s24 = scalar_lea.vmem %s33_s21, 128 }
  0x11   :  { %p1036_p5 = scmp.ne.s32.totalorder %s33_s21, %s1035_s24  ;;  %p1040_p6 = scmp.lt.s32.totalorder %s33_s21, %s33_s21 }
  0x12   :  { %p1041_p7 = scmp.lt.s32.totalorder %s1035_s24, %s1035_s24 }
  0x14   :  { %p1042_p8 = por %p1041_p7, %p1040_p6 }
  0x16   :  { %45 = dma.hbm_to_vmem [thread:$0]  %s1411_s23, 128, %s43_s30, [#allocation5]  }
  0x17   :  { %p1043_p9 = pnand %p1042_p8, %p1036_p5 }
  0x19   :  { %1046 = shalt.err (!%p1043_p9)
}
  0x1a   :  { %s1412_s26 = sld [smem:[#allocation9_spill]]  ;;  %s1073_s27 = smov [#allocation6]  }
  0x1b   :  { %s52_s28 = sshll.u32 %s1073_s27, 4  ;;  %s53_s28 = int_to_ptr.vmem [resolvable:$true] %s52_s28 }
  0x1c   :  { %s1055_s29 = scalar_lea.vmem %s53_s28, 128  ;;  %p1060_p11 = scmp.lt.s32.totalorder %s53_s28, %s53_s28 }
  0x1d   :  { %p1056_p10 = scmp.ne.s32.totalorder %s53_s28, %s1055_s29  ;;  %p1061_p12 = scmp.lt.s32.totalorder %s1055_s29, %s1055_s29 }
  0x1f   :  { %p1062_p13 = por %p1061_p12, %p1060_p11 }
  0x20   :  { %35 = dma.hbm_to_vmem [thread:$0]  %s1412_s26, 128, %s33_s21, [#allocation3]  }
  0x21   :  { %p1063_p0 = pnand %p1062_p13, %p1056_p10 }
  0x23   :  { %1066 = shalt.err (!%p1063_p0)
}
  0x24   :  { %s1413_s20 = sld [smem:[#allocation11_spill]] }
  0x2a   :  { %55 = dma.hbm_to_vmem [thread:$0]  %s1413_s20, 128, %s53_s28, [#allocation5]  }
  0x2b   :  { %1067 = dma.done.wait [#allocation3], 128  }
  0x2c   :  { %1068 = vsyncadd [#allocation3], 4294967168 }
  0x2d   :  { %1069 = dma.done.wait [#allocation5], 256  }
  0x2e   :  { %1070 = vsyncadd [#allocation5], 4294967040  ;;  %v1074_v0 = vmov 0.0   ;;  %vm1075_vm0 = vmmov 0   ;;  %s1414_s22 = sld [smem:[#allocation12_spill]]  ;;  %v191_v4 = vld [vmem:[%s1391_s5 + $0x18] sm:$0xff] }
  0x2f   :  { %891 = vmatprep.subr.mxu0 %v1074_v0  ;;  %907 = vmatprep.mubr.msk.f32.mxu0 %vm1075_vm0, %v1074_v0  ;;  %v97_v10 = vld [vmem:[#allocation2] sm:$0xff]  ;;  %vm113_vm1 = vcmask 523264   ;;  %v190_v11 = vld [vmem:[%s1391_s5 + $0x10] sm:$0xff]  ;;  %v189_v12 = vld [vmem:[%s1391_s5 + $0x8] sm:$0xff]  ;;  %vm199_vm2 = vcmask 261120   ;;  %vm292_vm3 = vcmask 130048  }
  0x30   :  { %910 = vmatprep.subr.mxu1 %v1074_v0  ;;  %918 = vmatprep.mubr.msk.f32.mxu1 %vm1075_vm0, %v1074_v0  ;;  %v188_v13 = vld [vmem:[%s1391_s5] sm:$0xff]  ;;  %s1076_s5 = smov 64   ;;  %v284_v25 = vld [vmem:[%s1393_s7 + $0x8] sm:$0xff]  ;;  %v370_v32 = vld [vmem:[%s1395_s9 + $0x18] sm:$0xff]  ;;  %vm822_vm4 = vcmask 785408  }
  0x31   :  { %911 = vmatpush3.msra.mxu1 %v191_v4  ;;  %v831_v14 = vld [vmem:[%s1390_s4] ss:$0 sm:$0xff]  ;;  %v273_v28 = vld [vmem:[#allocation4] sm:$0xff]  ;;  %v369_v33 = vld [vmem:[%s1395_s9 + $0x10] sm:$0xff] }
  0x32   :  { %912 = vmatprep.subr.mxu1 %v1074_v0  ;;  %v833_v19 = vld [vmem:[%s1392_s6] ss:$0 sm:$0xff]  ;;  %s1077_s6 = smov 112   ;;  %v368_v34 = vld [vmem:[%s1395_s9 + $0x8] sm:$0xff]  ;;  %v464_v41 = vld [vmem:[%s1397_s11 + $0x38] sm:$0xff] }
  0x33   :  { %913 = vmatpush3.msra.mxu1 %v190_v11  ;;  %v283_v26 = vld [vmem:[%s1393_s7] sm:$0xff]  ;;  %v463_v42 = vld [vmem:[%s1397_s11 + $0x30] sm:$0xff]  ;;  %v462_v43 = vld [vmem:[%s1397_s11 + $0x28] sm:$0xff] }
  0x34   :  { %v105_v1 = vld [vmem:[%s1414_s22 + $0x38] sm:$0xff]  ;;  %v104_v2 = vld [vmem:[%s1414_s22 + $0x30] sm:$0xff]  ;;  %v103_v3 = vld [vmem:[%s1414_s22 + $0x28] sm:$0xff]  ;;  %914 = vmatprep.subr.mxu1 %v1074_v0 }
  0x35   :  { %892 = vmatpush3.msra.mxu0 %v105_v1  ;;  %v102_v5 = vld [vmem:[%s1414_s22 + $0x20] sm:$0xff]  ;;  %v101_v6 = vld [vmem:[%s1414_s22 + $0x18] sm:$0xff]  ;;  %v100_v7 = vld [vmem:[%s1414_s22 + $0x10] sm:$0xff]  ;;  %915 = vmatpush3.msra.mxu1 %v189_v12 }
  0x36   :  { %893 = vmatprep.subr.mxu0 %v1074_v0  ;;  %v99_v8 = vld [vmem:[%s1414_s22 + $0x8] sm:$0xff]  ;;  %v98_v9 = vld [vmem:[%s1414_s22] sm:$0xff]  ;;  %916 = vmatprep.subr.mxu1 %v1074_v0  ;;  %v460_v45 = vld [vmem:[%s1397_s11 + $0x18] sm:$0xff] }
  0x37   :  { %894 = vmatpush3.msra.mxu0 %v104_v2  ;;  %917 = vmatpush3.msra.mxu1 %v188_v13  ;;  %v367_v35 = vld [vmem:[%s1395_s9] sm:$0xff]  ;;  %v459_v46 = vld [vmem:[%s1397_s11 + $0x10] sm:$0xff]  ;;  %v458_v47 = vld [vmem:[%s1397_s11 + $0x8] sm:$0xff] }
  0x38   :  { %895 = vmatprep.subr.mxu0 %v1074_v0  ;;  %921 = vmatprep.subr.mxu1 %v1074_v0  ;;  %v835_v36 = vld [vmem:[%s1394_s8] ss:$0 sm:$0xff]  ;;  %v549_v49 = vld [vmem:[%s1399_s13 + $0x18] sm:$0xff]  ;;  %v548_v59 = vld [vmem:[%s1399_s13 + $0x10] sm:$0xff] }
  0x39   :  { %896 = vmatpush3.msra.mxu0 %v103_v3  ;;  %v461_v44 = vld [vmem:[%s1397_s11 + $0x20] sm:$0xff]  ;;  %v547_v60 = vld [vmem:[%s1399_s13 + $0x8] sm:$0xff]  ;;  %v726_v12 = vld [vmem:[%s1403_s17 + $0x18] sm:$0xff] }
  0x3a   :  { %897 = vmatprep.subr.mxu0 %v1074_v0  ;;  %v457_v48 = vld [vmem:[%s1397_s11] sm:$0xff] }
  0x3b   :  { %898 = vmatpush3.msra.mxu0 %v102_v5  ;;  %v837_v50 = vld [vmem:[%s1396_s10] ss:$0 sm:$0xff] }
  0x3c   :  { %899 = vmatprep.subr.mxu0 %v1074_v0  ;;  %v546_v61 = vld [vmem:[%s1399_s13] sm:$0xff]  ;;  %s1078_s13 = smov 96  }
  0x3d   :  { %900 = vmatpush3.msra.mxu0 %v101_v6  ;;  %v839_v62 = vld [vmem:[%s1398_s12] ss:$0 sm:$0xff] }
  0x3e   :  { %901 = vmatprep.subr.mxu0 %v1074_v0  ;;  %v841_v4 = vld [vmem:[%s1400_s14] ss:$0 sm:$0xff] }
  0x3f   :  { %902 = vmatpush3.msra.mxu0 %v100_v7  ;;  %v640_v11 = vld [vmem:[%s1401_s15] sm:$0xff] }
  0x40   :  { %903 = vmatprep.subr.mxu0 %v1074_v0 }
  0x41   :  { %904 = vmatpush3.msra.mxu0 %v99_v8 }
  0x42   :  { %905 = vmatprep.subr.mxu0 %v1074_v0 }
  0x43   :  { %906 = vmatpush3.msra.mxu0 %v98_v9 }
  0x44   :  { %908 = vmatmul.mubr.msk.f32.vlgmr.msra.gmra.mxu0 %vm113_vm1, %v97_v10  ;;  %939 = vmatprep.subr.mxu0 %v1074_v0  ;;  %v641_v10 = vld [vmem:[%s1401_s15 + $0x8] sm:$0xff] }
  0x45   :  { %955 = vmatprep.mubr.msk.f32.mxu0 %vm1075_vm0, %v1074_v0  ;;  %940 = vmatpush3.msra.mxu0 %v464_v41 }
  0x46   :  { %941 = vmatprep.subr.mxu0 %v1074_v0 }
  0x47   :  { %942 = vmatpush3.msra.mxu0 %v463_v42 }
  0x48   :  { %943 = vmatprep.subr.mxu0 %v1074_v0 }
  0x49   :  { %944 = vmatpush3.msra.mxu0 %v462_v43 }
  0x4a   :  { %945 = vmatprep.subr.mxu0 %v1074_v0 }
  0x4b   :  { %946 = vmatpush3.msra.mxu0 %v461_v44 }
  0x4c   :  { %947 = vmatprep.subr.mxu0 %v1074_v0 }
  0x4d   :  { %948 = vmatpush3.msra.mxu0 %v460_v45 }
  0x4e   :  { %949 = vmatprep.subr.mxu0 %v1074_v0 }
  0x4f   :  { %950 = vmatpush3.msra.mxu0 %v459_v46 }
  0x50   :  { %951 = vmatprep.subr.mxu0 %v1074_v0 }
  0x51   :  { %952 = vmatpush3.msra.mxu0 %v458_v47 }
  0x52   :  { %953 = vmatprep.subr.mxu0 %v1074_v0 }
  0x53   :  { %954 = vmatpush3.msra.mxu0 %v457_v48 }
  0x54   :  { %976 = vmatprep.subr.mxu0 %v1074_v0 }
 0x104   :  { %v183_v15 = vpop.f32.mrf.mxu0 }
 0x105   :  { %v184_v16 = vadd.f32 %v831_v14, %v183_v15  ;;  %v630_v14 = vld [vmem:[#allocation6] sm:$0xff] }
 0x106   :  { %v909_v17 = vpop.f32.mrf.mxu0 }
 0x107   :  { %v187_v18 = vmax.f32 %v184_v16, 0.0 }
 0x109   :  { %919 = vmatmul.mubr.msk.f32.vlgmr.msra.gmra.mxu1 %vm199_vm2, %v187_v18  ;;  %v725_v18 = vld [vmem:[%s1403_s17 + $0x10] sm:$0xff] }
 0x10a   :  { %925 = vmatprep.mubr.msk.f32.mxu1 %vm1075_vm0, %v1074_v0  ;;  %922 = vmatpush3.msra.mxu1 %v284_v25 }
 0x10b   :  { %923 = vmatprep.subr.mxu1 %v1074_v0 }
 0x10c   :  { %924 = vmatpush3.msra.mxu1 %v283_v26  ;;  %v845_v26 = vld [vmem:[%s1404_s18] ss:$0 sm:$0xff] }
 0x10d   :  { %928 = vmatprep.subr.mxu1 %v1074_v0 }
 0x1c9   :  { %v269_v20 = vpop.f32.mrf.mxu1 }
 0x1ca   :  { %v270_v21 = vadd.f32 %v833_v19, %v269_v20  ;;  %v724_v19 = vld [vmem:[%s1403_s17 + $0x8] sm:$0xff]  ;;  %v723_v20 = vld [vmem:[%s1403_s17] sm:$0xff] }
 0x1cb   :  { %v920_v22 = vpop.f32.mrf.mxu1 }
 0x1cc   :  { %v274_v23 = vmul.f32 0.5, %v270_v21  ;;  %814 = vrot.lane.b32.xlu1 %v270_v21, %s1076_s5 }
 0x1ce   :  { %v275_v24 = vmul.f32 1.442695, %v274_v23 }
 0x1d0   :  { %995 = vpow2.f32 %v275_v24 }
 0x1dd   :  { %v996_v27 = vpop.eup %995 }
 0x1de   :  { %278 = vrot.lane.b32.xlu0 %v996_v27, %s1077_s6 }
 0x250   :  { %v279_v29 = vpop.permute.xlu0 %278 }
 0x251   :  { %v281_v30 = vmul.f32 %v279_v29, %v273_v28 }
 0x253   :  { %v282_v31 = vadd.f32 %v281_v30, %v270_v21  ;;  %v843_v21 = vld [vmem:[%s1402_s16] ss:$0 sm:$0xff] }
 0x255   :  { %926 = vmatmul.mubr.msk.f32.vlgmr.msra.gmra.mxu1 %vm292_vm3, %v282_v31 }
 0x256   :  { %929 = vmatpush3.msra.mxu1 %v370_v32  ;;  %936 = vmatprep.mubr.msk.f32.mxu1 %vm1075_vm0, %v1074_v0 }
 0x257   :  { %930 = vmatprep.subr.mxu1 %v1074_v0 }
 0x258   :  { %931 = vmatpush3.msra.mxu1 %v369_v33  ;;  %v815_v33 = vpop.permute.xlu1 %814 }
 0x259   :  { %932 = vmatprep.subr.mxu1 %v1074_v0 }
 0x25a   :  { %933 = vmatpush3.msra.mxu1 %v368_v34 }
 0x25b   :  { %934 = vmatprep.subr.mxu1 %v1074_v0 }
 0x25c   :  { %935 = vmatpush3.msra.mxu1 %v367_v35 }
 0x25d   :  { %958 = vmatprep.subr.mxu1 %v1074_v0 }
 0x315   :  { %v362_v37 = vpop.f32.mrf.mxu1 }
 0x316   :  { %v363_v38 = vadd.f32 %v835_v36, %v362_v37 }
 0x317   :  { %v927_v39 = vpop.f32.mrf.mxu1 }
 0x318   :  { %v366_v40 = vmax.f32 %v363_v38, 0.0 }
 0x31a   :  { %937 = vmatmul.mubr.msk.f32.vlgmr.msra.gmra.mxu1 %vm199_vm2, %v366_v40 }
 0x31b   :  { %966 = vmatprep.mubr.msk.f32.mxu1 %vm1075_vm0, %v1074_v0  ;;  %959 = vmatpush3.msra.mxu1 %v549_v49 }
 0x31c   :  { %960 = vmatprep.subr.mxu1 %v1074_v0 }
 0x31d   :  { %961 = vmatpush3.msra.mxu1 %v548_v59 }
 0x31e   :  { %962 = vmatprep.subr.mxu1 %v1074_v0 }
 0x31f   :  { %963 = vmatpush3.msra.mxu1 %v547_v60 }
 0x320   :  { %964 = vmatprep.subr.mxu1 %v1074_v0 }
 0x321   :  { %965 = vmatpush3.msra.mxu1 %v546_v61 }
 0x322   :  { %969 = vmatprep.subr.mxu1 %v1074_v0 }
 0x3da   :  { %v447_v51 = vpop.f32.mrf.mxu1 }
 0x3db   :  { %v448_v52 = vadd.f32 %v837_v50, %v447_v51 }
 0x3dc   :  { %v938_v53 = vpop.f32.mrf.mxu1 }
 0x3dd   :  { %v451_v54 = vsub.f32 0.0, %v448_v52 }
 0x3df   :  { %v452_v55 = vmul.f32 1.442695, %v451_v54 }
 0x3e1   :  { %997 = vpow2.f32 %v452_v55 }
 0x3ee   :  { %v998_v56 = vpop.eup %997 }
 0x3ef   :  { %v454_v57 = vadd.f32 1.0, %v998_v56 }
 0x3f1   :  { %999 = vrcp.f32 %v454_v57 }
 0x3fe   :  { %v1000_v58 = vpop.eup %999 }
 0x3ff   :  { %956 = vmatmul.mubr.msk.f32.vlgmr.msra.gmra.mxu0 %vm113_vm1, %v1000_v58 }
 0x400   :  { %984 = vmatprep.mubr.msk.f32.mxu0 %vm1075_vm0, %v1074_v0  ;;  %977 = vmatpush3.msra.mxu0 %v726_v12 }
 0x401   :  { %978 = vmatprep.subr.mxu0 %v1074_v0 }
 0x402   :  { %979 = vmatpush3.msra.mxu0 %v725_v18 }
 0x403   :  { %980 = vmatprep.subr.mxu0 %v1074_v0 }
 0x404   :  { %981 = vmatpush3.msra.mxu0 %v724_v19 }
 0x405   :  { %982 = vmatprep.subr.mxu0 %v1074_v0 }
 0x406   :  { %983 = vmatpush3.msra.mxu0 %v723_v20 }
 0x4bf   :  { %v541_v63 = vpop.f32.mrf.mxu0 }
 0x4c0   :  { %v542_v1 = vadd.f32 %v839_v62, %v541_v63 }
 0x4c1   :  { %v957_v2 = vpop.f32.mrf.mxu0 }
 0x4c2   :  { %v545_v3 = vmax.f32 %v542_v1, 0.0 }
 0x4c4   :  { %967 = vmatmul.mubr.msk.f32.vlgmr.msra.gmra.mxu1 %vm199_vm2, %v545_v3 }
 0x4c5   :  { %973 = vmatprep.mubr.msk.f32.mxu1 %vm1075_vm0, %v1074_v0  ;;  %970 = vmatpush3.msra.mxu1 %v641_v10 }
 0x4c6   :  { %971 = vmatprep.subr.mxu1 %v1074_v0 }
 0x4c7   :  { %972 = vmatpush3.msra.mxu1 %v640_v11 }
 0x584   :  { %v626_v5 = vpop.f32.mrf.mxu1 }
 0x585   :  { %v627_v6 = vadd.f32 %v841_v4, %v626_v5 }
 0x586   :  { %v968_v7 = vpop.f32.mrf.mxu1 }
 0x587   :  { %v631_v8 = vmul.f32 0.5, %v627_v6  ;;  %818 = vrot.lane.b32.xlu1 %v627_v6, %s1078_s13 }
 0x589   :  { %v632_v9 = vmul.f32 1.442695, %v631_v8 }
 0x58b   :  { %1001 = vpow2.f32 %v632_v9 }
 0x598   :  { %v1002_v13 = vpop.eup %1001 }
 0x599   :  { %635 = vrot.lane.b32.xlu0 %v1002_v13, %s1077_s6 }
 0x5f9   :  { %v819_v35 = vpop.permute.xlu1 %818 }
 0x60b   :  { %v636_v15 = vpop.permute.xlu0 %635 }
 0x60c   :  { %v638_v16 = vmul.f32 %v636_v15, %v630_v14 }
 0x60e   :  { %v639_v17 = vadd.f32 %v638_v16, %v627_v6 }
 0x610   :  { %974 = vmatmul.mubr.msk.f32.vlgmr.msra.gmra.mxu1 %vm292_vm3, %v639_v17 }
 0x6d0   :  { %v718_v22 = vpop.f32.mrf.mxu1 }
 0x6d1   :  { %v719_v23 = vadd.f32 %v843_v21, %v718_v22 }
 0x6d2   :  { %v975_v24 = vpop.f32.mrf.mxu1 }
 0x6d3   :  { %v722_v25 = vmax.f32 %v719_v23, 0.0 }
 0x6d5   :  { %985 = vmatmul.mubr.msk.f32.vlgmr.msra.gmra.mxu0 %vm199_vm2, %v722_v25 }
 0x795   :  { %v803_v0 = vpop.f32.mrf.mxu0 }
 0x796   :  { %v804_v27 = vadd.f32 %v845_v26, %v803_v0 }
 0x797   :  { %v986_v28 = vpop.f32.mrf.mxu0 }
 0x798   :  { %v807_v29 = vsub.f32 0.0, %v804_v27 }
 0x79a   :  { %v808_v30 = vmul.f32 1.442695, %v807_v29 }
 0x79c   :  { %1003 = vpow2.f32 %v808_v30 }
 0x7a9   :  { %v1004_v31 = vpop.eup %1003 }
 0x7aa   :  { %v810_v32 = vadd.f32 1.0, %v1004_v31 }
 0x7ac   :  { %1005 = vrcp.f32 %v810_v32 }
 0x7b9   :  { %v1006_v34 = vpop.eup %1005 }
 0x7ba   :  { %v821_v36 = vsel %vm113_vm1, %v1006_v34, %v815_v33 }
 0x7bb   :  { %v823_v37 = vsel %vm822_vm4, %v821_v36, %v819_v35 }
 0x7bc   :  { %824 = vst [vmem:[%s1405_s19] sm:$0xff] %v823_v37 }
 0x7bd   :  { %829 = vsyncpa [#allocation3], 1 }
 0x7be   :  { %830 = vsyncpa [#allocation5], 1 }

</bundles_post_ra>
